<compile_context>
chip_gen: v6e
topology: v6e:2x2x1
jax: 0.10.0
libtpu: 0.0.40
codegen_flags: <defaults>
</compile_context>

<pallas_src>
import jax
import jax.numpy as jnp
from jax.experimental import pallas as pl
from jax.experimental.pallas import tpu as pltpu


# ----------------------------- Pallas kernel ------------------------------- #
def _conv_logsoftmax_kernel(x_ref, w_ref, b_ref, o_ref):
    # x_ref: (K, TM) f32, w_ref: (C, K) f32, b_ref: (C, 1) f32, o_ref: (C, TM) f32
    # MXU matmul -> (C, TM) logits; bias add + numerically stable log-softmax
    # over the channel (sublane) axis on the VPU/XLU/EUP.
    logits = jnp.dot(w_ref[...], x_ref[...],
                     preferred_element_type=jnp.float32) + b_ref[...]
    m = jnp.max(logits, axis=0, keepdims=True)
    shifted = logits - m
    lse = jnp.log(jnp.sum(jnp.exp(shifted), axis=0, keepdims=True))
    o_ref[...] = (shifted - lse).astype(o_ref.dtype)


def _run_kernel(x_t, w_mat, bias_col, tm_max=1024):
    """x_t: (K, M), w_mat: (C, K), bias_col: (C, 1) -> (C, M) log-softmax'd logits."""
    K, M = x_t.shape
    C = w_mat.shape[0]

    # Lane tile over M: multiple of 128, capped at tm_max, no bigger than needed.
    m_rounded = ((M + 127) // 128) * 128
    tm = min(tm_max, m_rounded)
    n_tiles = pl.cdiv(M, tm)
    m_pad = n_tiles * tm
    if m_pad != M:
        # Padded columns see only the bias; they are clipped off below and never
        # feed any kept output.
        x_t = jnp.pad(x_t, ((0, 0), (0, m_pad - M)))

    out = pl.pallas_call(
        _conv_logsoftmax_kernel,
        out_shape=jax.ShapeDtypeStruct((C, m_pad), jnp.float32),
        grid=(n_tiles,),
        in_specs=[
            pl.BlockSpec((K, tm), lambda i: (0, i)),    # streamed X tile
            pl.BlockSpec((C, K), lambda i: (0, 0)),     # weight, resident
            pl.BlockSpec((C, 1), lambda i: (0, 0)),     # bias, resident
        ],
        out_specs=pl.BlockSpec((C, tm), lambda i: (0, i)),
        compiler_params=pltpu.CompilerParams(
            dimension_semantics=("parallel",)),
    )(x_t, w_mat, bias_col)

    if m_pad != M:
        out = out[:, :M]
    return out


# ------------------------------ Module wrapper ------------------------------ #
class TopNetworkPallas:
    """JAX/Pallas equivalent of the PyTorch `topnetwork` module."""

    CIN = 40
    COUT = 4
    KH = 1
    KW = 11

    def __init__(self, key):
        # Xavier-uniform init (gain=1) for conv weight, zeros for bias,
        # matching torch.nn.init.xavier_uniform_ / constant_(0).
        fan_in = self.CIN * self.KH * self.KW     # 440
        fan_out = self.COUT * self.KH * self.KW   # 44
        bound = (6.0 / (fan_in + fan_out)) ** 0.5
        self.weight = jax.random.uniform(
            key, (self.COUT, self.CIN, self.KH, self.KW),
            dtype=jnp.float32, minval=-bound, maxval=bound)
        self.bias = jnp.zeros((self.COUT,), dtype=jnp.float32)

    def __call__(self, x):
        # x: (N, 40, H, 11) NCHW, float32.  Valid conv with kernel (1, 11) =>
        # output width 1; _squeeze_final_output then drops the W dim and, only
        # if H == 1, the H dim (the batch dim is never dropped).
        N, Cin, H, W = x.shape
        assert Cin == self.CIN and W == self.KW

        # Transposed im2col: (N, Cin, H, W) -> (Cin, W, N, H) -> (K=440, M=N*H)
        # K on sublanes (multiple of 8), M on lanes (lane-dense).
        x_t = jnp.transpose(x, (1, 3, 0, 2)).reshape(Cin * W, N * H)
        # weight (Cout, Cin, 1, KW) -> (Cout, Cin*KW)
        w_mat = self.weight.reshape(self.COUT, Cin * W)
        bias_col = self.bias.reshape(self.COUT, 1)

        out = _run_kernel(x_t, w_mat, bias_col)            # (C, N*H)

        out = out.reshape(self.COUT, N, H)                 # (C, N, H)
        out = jnp.transpose(out, (1, 0, 2))                # (N, C, H)
        if H == 1:
            out = out[:, :, 0]                             # (N, C)
        return out


# ---------------------------------- main ----------------------------------- #
if __name__ == "__main__":
    key = jax.random.PRNGKey(0)
    k_param, k_input = jax.random.split(key)

    net = TopNetworkPallas(k_param)

    # Small input consistent with the module: N=2, Cin=40, H=16, W=11
    x = jax.random.normal(k_input, (2, 40, 16, 11), dtype=jnp.float32)

    fwd = jax.jit(net.__call__)
    y = jax.block_until_ready(fwd(x))

    # Shape check: (N, 4, H)
    assert y.shape == (2, 4, 16), y.shape

    # Reference check against a plain-JAX conv + log_softmax.
    logits_ref = jnp.einsum("nchw,ocw->noh", x, net.weight[:, :, 0, :]) \
        + net.bias[None, :, None]
    y_ref = jax.nn.log_softmax(logits_ref, axis=1)
    assert bool(jnp.max(jnp.abs(y - y_ref)) < 1e-4)

    # Each channel slice is a valid log-softmax.
    probs_sum = jnp.sum(jnp.exp(y), axis=1)
    assert bool(jnp.all(jnp.abs(probs_sum - 1.0) < 1e-4))

    print("KERNEL_OK")
</pallas_src>

<mosaic_0001>
module attributes {stable_mosaic.version = 11 : i64} {
  func.func @_conv_logsoftmax_kernel(%arg0: i32, %arg1: memref<440x128xf32, #tpu.memory_space<vmem>>, %arg2: memref<4x440xf32, #tpu.memory_space<vmem>>, %arg3: memref<4x1xf32, #tpu.memory_space<vmem>>, %arg4: memref<4x128xf32, #tpu.memory_space<vmem>>) attributes {dimension_semantics = [#tpu.dimension_semantics<parallel>], iteration_bounds = array<i64: 1>, scalar_prefetch = 0 : i64, scratch_operands = 0 : i64, tpu.core_type = #tpu.core_type<tc>, window_params = [{transform_indices = @transform_0, window_bounds = array<i64: 440, 128>}, {pipeline_mode = #tpu.pipeline_mode<synchronous>, transform_indices = @transform_1, window_bounds = array<i64: 4, 440>}, {pipeline_mode = #tpu.pipeline_mode<synchronous>, transform_indices = @transform_2, window_bounds = array<i64: 4, 1>}, {transform_indices = @transform_3, window_bounds = array<i64: 4, 128>}]} {
    %c0 = arith.constant 0 : index
    %c0_0 = arith.constant 0 : index
    %0 = vector.load %arg2[%c0, %c0_0] : memref<4x440xf32, #tpu.memory_space<vmem>>, vector<4x440xf32>
    %c0_1 = arith.constant 0 : index
    %c0_2 = arith.constant 0 : index
    %1 = vector.load %arg1[%c0_1, %c0_2] : memref<440x128xf32, #tpu.memory_space<vmem>>, vector<440x128xf32>
    %cst = arith.constant dense<0.000000e+00> : vector<4x128xf32>
    %2 = tpu.matmul %0, %1, %cst {dimension_numbers = #tpu.dot_dimension_numbers<[1], [0], [0], [1], [0, 0, 1, 1], [], []>} : vector<4x440xf32>, vector<440x128xf32>, vector<4x128xf32> -> vector<4x128xf32>
    %c0_3 = arith.constant 0 : index
    %c0_4 = arith.constant 0 : index
    %3 = vector.load %arg3[%c0_3, %c0_4] : memref<4x1xf32, #tpu.memory_space<vmem>>, vector<4x1xf32>
    %4 = vector.broadcast %3 : vector<4x1xf32> to vector<4x128xf32>
    %5 = arith.addf %2, %4 : vector<4x128xf32>
    %cst_5 = arith.constant dense<0xFF800000> : vector<128xf32>
    %6 = vector.multi_reduction <maximumf>, %5, %cst_5 [0] : vector<4x128xf32> to vector<128xf32>
    %7 = vector.shape_cast %6 : vector<128xf32> to vector<1x128xf32>
    %8 = vector.broadcast %7 : vector<1x128xf32> to vector<4x128xf32>
    %9 = arith.subf %5, %8 : vector<4x128xf32>
    %10 = math.exp %9 : vector<4x128xf32>
    %cst_6 = arith.constant dense<0.000000e+00> : vector<128xf32>
    %11 = vector.multi_reduction <add>, %10, %cst_6 [0] : vector<4x128xf32> to vector<128xf32>
    %12 = vector.shape_cast %11 : vector<128xf32> to vector<1x128xf32>
    %13 = math.log %12 : vector<1x128xf32>
    %14 = vector.broadcast %13 : vector<1x128xf32> to vector<4x128xf32>
    %15 = arith.subf %9, %14 : vector<4x128xf32>
    %c0_7 = arith.constant 0 : index
    %c0_8 = arith.constant 0 : index
    %16 = vector.load %arg4[%c0_7, %c0_8] : memref<4x128xf32, #tpu.memory_space<vmem>>, vector<4x128xf32>
    tpu.vector_store %arg4[%c0_7, %c0_8], %15 {strides = array<i32>} : memref<4x128xf32, #tpu.memory_space<vmem>>, vector<4x128xf32>,
    return
  }
  func.func @transform_0(%arg0: i32) -> (i32, i32) {
    %c0_i32 = arith.constant 0 : i32
    %c0_i32_0 = arith.constant 0 : i32
    return %c0_i32, %arg0 : i32, i32
  }
  func.func @transform_1(%arg0: i32) -> (i32, i32) {
    %c0_i32 = arith.constant 0 : i32
    %c0_i32_0 = arith.constant 0 : i32
    %c0_i32_1 = arith.constant 0 : i32
    return %c0_i32, %c0_i32_0 : i32, i32
  }
  func.func @transform_2(%arg0: i32) -> (i32, i32) {
    %c0_i32 = arith.constant 0 : i32
    %c0_i32_0 = arith.constant 0 : i32
    %c0_i32_1 = arith.constant 0 : i32
    return %c0_i32, %c0_i32_0 : i32, i32
  }
  func.func @transform_3(%arg0: i32) -> (i32, i32) {
    %c0_i32 = arith.constant 0 : i32
    %c0_i32_0 = arith.constant 0 : i32
    return %c0_i32, %arg0 : i32, i32
  }
}

</mosaic_0001>

<bundles_post_ra>
// kernel: a_call__.1
= control target key start
LH: loop header
LB: loop body
LE: loop exit
PB: predicated region body
PF: predicated region fallthrough
CT: control target
= control target key end

     0   :  { %v296_v0 = vmov 0.0   ;;  %v297_v3 = vmov 0   ;;  %vm82_vm0 = vcmask 457728   ;;  %vm225_vm1 = vcmask 1043456   ;;  %s518_s0 = inlined_call_operand.vmem [shape: f32[440,128], index: 0, kind: input, shape index: {}]   ;;  %s519_s1 = inlined_call_operand.vmem [shape: f32[4,440], index: 1, kind: input, shape index: {}]   ;;  %s520_s2 = inlined_call_operand.vmem [shape: f32[4,1], index: 2, kind: input, shape index: {}]   ;;  %s521_s3 = inlined_call_operand.vmem [shape: f32[4,128], index: 3, kind: output, shape index: {}]  }
   0x1   :  { %155 = vmatprep.subr.mxu1 %v296_v0  ;;  %v63_v1 = vld [vmem:[%s518_s0 + $0x178] sm:$0xff]  ;;  %v62_v2 = vld [vmem:[%s518_s0 + $0x170] sm:$0xff]  ;;  %289 = vset.pattern.permute.xlu0 %v297_v3  ;;  %v61_v6 = vld [vmem:[%s518_s0 + $0x168] sm:$0xff] }
   0x2   :  { %156 = vmatpush1.msra.mxu1 %v63_v1  ;;  %v47_v4 = vld [vmem:[%s518_s0 + $0xf8] sm:$0xff]  ;;  %v46_v7 = vld [vmem:[%s518_s0 + $0xf0] sm:$0xff]  ;;  %v45_v9 = vld [vmem:[%s518_s0 + $0xe8] sm:$0xff] }
   0x3   :  { %v31_v5 = vld [vmem:[%s518_s0 + $0x78] sm:$0xff]  ;;  %157 = vmatprep.subr.mxu1 %v296_v0  ;;  %252 = vmatprep.subr.mxu0 %v47_v4  ;;  %v30_v8 = vld [vmem:[%s518_s0 + $0x70] sm:$0xff]  ;;  %v60_v10 = vld [vmem:[%s518_s0 + $0x160] sm:$0xff] }
   0x4   :  { %158 = vmatpush1.msra.mxu1 %v62_v2  ;;  %253 = vmatpush3.msra.mxu0 %v31_v5  ;;  %v29_v11 = vld [vmem:[%s518_s0 + $0x68] sm:$0xff]  ;;  %v44_v12 = vld [vmem:[%s518_s0 + $0xe0] sm:$0xff]  ;;  %v59_v13 = vld [vmem:[%s518_s0 + $0x158] sm:$0xff] }
   0x5   :  { %159 = vmatprep.subr.mxu1 %v296_v0  ;;  %254 = vmatprep.subr.mxu0 %v46_v7  ;;  %v28_v14 = vld [vmem:[%s518_s0 + $0x60] sm:$0xff]  ;;  %v43_v15 = vld [vmem:[%s518_s0 + $0xd8] sm:$0xff]  ;;  %v58_v16 = vld [vmem:[%s518_s0 + $0x150] sm:$0xff] }
   0x6   :  { %160 = vmatpush1.msra.mxu1 %v61_v6  ;;  %255 = vmatpush3.msra.mxu0 %v30_v8  ;;  %v27_v17 = vld [vmem:[%s518_s0 + $0x58] sm:$0xff]  ;;  %v42_v18 = vld [vmem:[%s518_s0 + $0xd0] sm:$0xff]  ;;  %v57_v19 = vld [vmem:[%s518_s0 + $0x148] sm:$0xff] }
   0x7   :  { %161 = vmatprep.subr.mxu1 %v296_v0  ;;  %256 = vmatprep.subr.mxu0 %v45_v9  ;;  %v26_v20 = vld [vmem:[%s518_s0 + $0x50] sm:$0xff]  ;;  %v41_v21 = vld [vmem:[%s518_s0 + $0xc8] sm:$0xff]  ;;  %v56_v22 = vld [vmem:[%s518_s0 + $0x140] sm:$0xff] }
   0x8   :  { %162 = vmatpush1.msra.mxu1 %v60_v10  ;;  %257 = vmatpush3.msra.mxu0 %v29_v11  ;;  %v25_v23 = vld [vmem:[%s518_s0 + $0x48] sm:$0xff]  ;;  %v40_v24 = vld [vmem:[%s518_s0 + $0xc0] sm:$0xff]  ;;  %v55_v25 = vld [vmem:[%s518_s0 + $0x138] sm:$0xff] }
   0x9   :  { %163 = vmatprep.subr.mxu1 %v296_v0  ;;  %258 = vmatprep.subr.mxu0 %v44_v12  ;;  %v24_v26 = vld [vmem:[%s518_s0 + $0x40] sm:$0xff]  ;;  %v39_v27 = vld [vmem:[%s518_s0 + $0xb8] sm:$0xff]  ;;  %v54_v28 = vld [vmem:[%s518_s0 + $0x130] sm:$0xff] }
   0xa   :  { %164 = vmatpush1.msra.mxu1 %v59_v13  ;;  %259 = vmatpush3.msra.mxu0 %v28_v14  ;;  %v23_v29 = vld [vmem:[%s518_s0 + $0x38] sm:$0xff]  ;;  %v38_v30 = vld [vmem:[%s518_s0 + $0xb0] sm:$0xff]  ;;  %v53_v31 = vld [vmem:[%s518_s0 + $0x128] sm:$0xff] }
   0xb   :  { %165 = vmatprep.subr.mxu1 %v296_v0  ;;  %260 = vmatprep.subr.mxu0 %v43_v15  ;;  %v22_v32 = vld [vmem:[%s518_s0 + $0x30] sm:$0xff]  ;;  %v37_v33 = vld [vmem:[%s518_s0 + $0xa8] sm:$0xff]  ;;  %v52_v34 = vld [vmem:[%s518_s0 + $0x120] sm:$0xff] }
   0xc   :  { %166 = vmatpush1.msra.mxu1 %v58_v16  ;;  %261 = vmatpush3.msra.mxu0 %v27_v17  ;;  %v21_v35 = vld [vmem:[%s518_s0 + $0x28] sm:$0xff]  ;;  %v36_v36 = vld [vmem:[%s518_s0 + $0xa0] sm:$0xff]  ;;  %v51_v37 = vld [vmem:[%s518_s0 + $0x118] sm:$0xff] }
   0xd   :  { %167 = vmatprep.subr.mxu1 %v296_v0  ;;  %262 = vmatprep.subr.mxu0 %v42_v18  ;;  %v20_v38 = vld [vmem:[%s518_s0 + $0x20] sm:$0xff]  ;;  %v35_v39 = vld [vmem:[%s518_s0 + $0x98] sm:$0xff]  ;;  %v50_v40 = vld [vmem:[%s518_s0 + $0x110] sm:$0xff] }
   0xe   :  { %168 = vmatpush1.msra.mxu1 %v57_v19  ;;  %263 = vmatpush3.msra.mxu0 %v26_v20  ;;  %v19_v41 = vld [vmem:[%s518_s0 + $0x18] sm:$0xff]  ;;  %v34_v42 = vld [vmem:[%s518_s0 + $0x90] sm:$0xff]  ;;  %v49_v43 = vld [vmem:[%s518_s0 + $0x108] sm:$0xff] }
   0xf   :  { %169 = vmatprep.subr.mxu1 %v296_v0  ;;  %264 = vmatprep.subr.mxu0 %v41_v21  ;;  %v18_v44 = vld [vmem:[%s518_s0 + $0x10] sm:$0xff]  ;;  %v33_v45 = vld [vmem:[%s518_s0 + $0x88] sm:$0xff]  ;;  %v14_v46 = vld [vmem:[%s519_s1] sm:$0xff] }
  0x10   :  { %170 = vmatpush1.msra.mxu1 %v56_v22  ;;  %265 = vmatpush3.msra.mxu0 %v25_v23  ;;  %v48_v47 = vld [vmem:[%s518_s0 + $0x100] sm:$0xff]  ;;  %v17_v48 = vld [vmem:[%s518_s0 + $0x8] sm:$0xff]  ;;  %v70_v51 = vld [vmem:[%s518_s0 + $0x1b0] sm:$0xff]  ;;  %v79_v53 = vcombine.high %v14_v46, %v14_v46 }
  0x11   :  { %171 = vmatprep.subr.mxu1 %v296_v0  ;;  %266 = vmatprep.subr.mxu0 %v40_v24  ;;  %v32_v49 = vld [vmem:[%s518_s0 + $0x80] sm:$0xff]  ;;  %v15_v50 = vld [vmem:[%s519_s1 + $0x8] sm:$0xff]  ;;  %v67_v58 = vld [vmem:[%s518_s0 + $0x198] sm:$0xff] }
  0x12   :  { %172 = vmatpush1.msra.mxu1 %v55_v25  ;;  %267 = vmatpush3.msra.mxu0 %v24_v26  ;;  %v16_v52 = vld [vmem:[%s518_s0] sm:$0xff]  ;;  %v69_v54 = vld [vmem:[%s518_s0 + $0x1a8] sm:$0xff]  ;;  %v80_v55 = vcombine.high %v15_v50, %v15_v50  ;;  %v66_v59 = vld [vmem:[%s518_s0 + $0x190] sm:$0xff] }
  0x13   :  { %173 = vmatprep.subr.mxu1 %v296_v0  ;;  %268 = vmatprep.subr.mxu0 %v39_v27  ;;  %v68_v56 = vld [vmem:[%s518_s0 + $0x1a0] sm:$0xff]  ;;  %v65_v60 = vld [vmem:[%s518_s0 + $0x188] sm:$0xff] }
  0x14   :  { %174 = vmatpush1.msra.mxu1 %v54_v28  ;;  %269 = vmatpush3.msra.mxu0 %v23_v29  ;;  %v71_v57 = vld [vmem:[%s520_s2] sm:$0xf] }
  0x15   :  { %175 = vmatprep.subr.mxu1 %v296_v0  ;;  %270 = vmatprep.subr.mxu0 %v38_v30  ;;  %v64_v61 = vld [vmem:[%s518_s0 + $0x180] sm:$0xff] }
  0x16   :  { %176 = vmatpush1.msra.mxu1 %v53_v31  ;;  %271 = vmatpush3.msra.mxu0 %v22_v32 }
  0x17   :  { %177 = vmatprep.subr.mxu1 %v296_v0  ;;  %272 = vmatprep.subr.mxu0 %v37_v33 }
  0x18   :  { %178 = vmatpush1.msra.mxu1 %v52_v34  ;;  %273 = vmatpush3.msra.mxu0 %v21_v35 }
  0x19   :  { %179 = vmatprep.subr.mxu1 %v296_v0  ;;  %274 = vmatprep.subr.mxu0 %v36_v36 }
  0x1a   :  { %180 = vmatpush1.msra.mxu1 %v51_v37  ;;  %275 = vmatpush3.msra.mxu0 %v20_v38 }
  0x1b   :  { %181 = vmatprep.subr.mxu1 %v296_v0  ;;  %276 = vmatprep.subr.mxu0 %v35_v39 }
  0x1c   :  { %182 = vmatpush1.msra.mxu1 %v50_v40  ;;  %277 = vmatpush3.msra.mxu0 %v19_v41 }
  0x1d   :  { %183 = vmatprep.subr.mxu1 %v296_v0  ;;  %278 = vmatprep.subr.mxu0 %v34_v42 }
  0x1e   :  { %184 = vmatpush1.msra.mxu1 %v49_v43  ;;  %279 = vmatpush3.msra.mxu0 %v18_v44 }
  0x1f   :  { %185 = vmatprep.subr.mxu1 %v296_v0  ;;  %280 = vmatprep.subr.mxu0 %v33_v45 }
  0x20   :  { %186 = vmatpush1.msra.mxu1 %v48_v47  ;;  %281 = vmatpush3.msra.mxu0 %v17_v48 }
  0x21   :  { %205 = vmatprep.subr.mxu1 %v296_v0  ;;  %282 = vmatprep.subr.mxu0 %v32_v49 }
  0x22   :  { %206 = vmatpush2.msra.mxu1 %v70_v51  ;;  %283 = vmatpush3.msra.mxu0 %v16_v52 }
  0x23   :  { %207 = vmatprep.subr.mxu1 %v296_v0  ;;  %149 = vmatprep.mubr.f32.mxu0 %v79_v53 }
  0x24   :  { %208 = vmatpush2.msra.mxu1 %v69_v54  ;;  %150 = vmatmul.mubr.f32.vlgmr.msra.gmra.mxu0 %v14_v46 }
  0x25   :  { %209 = vmatprep.subr.mxu1 %v296_v0  ;;  %251 = vmatprep.mubr.msk.f32.mxu1 %vm82_vm0, %v80_v55 }
  0x26   :  { %210 = vmatpush2.msra.mxu1 %v68_v56  ;;  %74 = vperm.xlu0 %289, %v71_v57  }
  0x27   :  { %211 = vmatprep.subr.mxu1 %v296_v0 }
  0x28   :  { %212 = vmatpush2.msra.mxu1 %v67_v58 }
  0x29   :  { %213 = vmatprep.subr.mxu1 %v296_v0 }
  0x2a   :  { %214 = vmatpush2.msra.mxu1 %v66_v59 }
  0x2b   :  { %215 = vmatprep.subr.mxu1 %v296_v0 }
  0x2c   :  { %216 = vmatpush2.msra.mxu1 %v65_v60 }
  0x2d   :  { %217 = vmatprep.subr.mxu1 %v296_v0 }
  0x2e   :  { %218 = vmatpush2.msra.mxu1 %v64_v61 }
  0x2f   :  { %220 = vmatmul.mubr.f32.vlgmr.msra.gmra.mxu1 %v15_v50 }
  0xa1   :  { %v75_v2 = vpop.permute.xlu0 %74 }
  0xe4   :  { %v284_v62 = vpop.f32.mrf.mxu0 }
  0xe6   :  { %v285_v63 = vpop.f32.mrf.mxu0 }
  0xe7   :  { %v286_v1 = vadd.f32 %v285_v63, %v284_v62 }
  0xe9   :  { %v152_v3 = vadd.f32 %v286_v1, %v75_v2 }
  0xef   :  { %v221_v4 = vpop.f32.mrf.mxu1 }
  0xf0   :  { %v222_v5 = vadd.f32 %v221_v4, %v152_v3 }
  0xf1   :  { %v223_v6 = vpop.f32.mrf.mxu1 }
  0xf2   :  { %v226_v7 = vsel %vm225_vm1, %v222_v5, -inf }
  0xf3   :  { %v227_v8 = vrot.slane %v226_v7, 4 }
  0xf5   :  { %v228_v9 = vmax.f32 %v226_v7, %v227_v8 }
  0xf7   :  { %v229_v10 = vrot.slane %v228_v9, 2 }
  0xf9   :  { %v230_v11 = vmax.f32 %v228_v9, %v229_v10 }
  0xfb   :  { %v231_v12 = vrot.slane %v230_v11, 1 }
  0xfd   :  { %v232_v13 = vmax.f32 %v230_v11, %v231_v12 }
  0xff   :  { %v233_v14 = vsub.f32 %v222_v5, %v232_v13 }
 0x101   :  { %v234_v0 = vmul.f32 1.442695, %v233_v14 }
 0x103   :  { %292 = vpow2.f32 %v234_v0 }
 0x110   :  { %v293_v15 = vpop.eup %292 }
 0x111   :  { %v236_v16 = vsel %vm225_vm1, %v293_v15, 0.0 }
 0x112   :  { %v237_v17 = vrot.slane %v236_v16, 4 }
 0x114   :  { %v238_v18 = vadd.f32 %v237_v17, %v236_v16 }
 0x116   :  { %v239_v19 = vrot.slane %v238_v18, 2 }
 0x118   :  { %v240_v20 = vadd.f32 %v239_v19, %v238_v18 }
 0x11a   :  { %v241_v21 = vrot.slane %v240_v20, 1 }
 0x11c   :  { %v242_v22 = vadd.f32 %v241_v21, %v240_v20 }
 0x11e   :  { %294 = vlog2.f32 %v242_v22 }
 0x12b   :  { %v295_v23 = vpop.eup %294 }
 0x12c   :  { %v244_v24 = vmul.f32 0.6931472, %v295_v23 }
 0x12e   :  { %v245_v25 = vsub.f32 %v233_v14, %v244_v24 }
 0x130   :  { %246 = vst [vmem:[%s521_s3] sm:$0xf] %v245_v25 }

</bundles_post_ra>
